<compile_context>
chip_gen: v6e
topology: v6e:2x2x1
jax: 0.10.0
libtpu: 0.0.40
codegen_flags: <defaults>
</compile_context>

<pallas_src>
import jax
import jax.numpy as jnp
from jax import lax
from jax.experimental import pallas as pl
from jax.experimental.pallas import tpu as pltpu


def _round_up(x, m):
    return ((x + m - 1) // m) * m


# --------------------------------------------------------------------------- #
# Kernels
# --------------------------------------------------------------------------- #
def _mlp_repr_kernel_single_k(x_ref, w_ref, b_ref, o_ref):
    """Single K block: fused GEMM + bias + sigmoid. No accumulator, no control flow."""
    # x_ref: (TB, K)  w_ref: (TO, K)  b_ref: (1, TO)  o_ref: (TB, TO)
    z = lax.dot_general(
        x_ref[...], w_ref[...],
        dimension_numbers=(((1,), (1,)), ((), ())),   # contract last dims (trans-B)
        preferred_element_type=jnp.float32,
    ) + b_ref[...]
    # sigmoid(z) = 0.5 * tanh(0.5 * z) + 0.5  (single EUP op, no divide)
    o_ref[...] = (0.5 * jnp.tanh(0.5 * z) + 0.5).astype(o_ref.dtype)


def _mlp_repr_kernel_multi_k(x_ref, w_ref, b_ref, o_ref):
    """K-tiled path: accumulate directly into the resident f32 output block."""
    k = pl.program_id(2)

    @pl.when(k == 0)
    def _():
        o_ref[...] = jnp.zeros_like(o_ref)

    o_ref[...] += lax.dot_general(
        x_ref[...], w_ref[...],
        dimension_numbers=(((1,), (1,)), ((), ())),
        preferred_element_type=jnp.float32,
    )

    @pl.when(k == pl.num_programs(2) - 1)
    def _():
        z = o_ref[...] + b_ref[...]
        o_ref[...] = (0.5 * jnp.tanh(0.5 * z) + 0.5).astype(o_ref.dtype)


# --------------------------------------------------------------------------- #
# Wrapper
# --------------------------------------------------------------------------- #
def mlp_representation(latent, weight, bias, *, tb=512, to=512, tk=2048):
    """latent: (B, L); weight: (O, L) (PyTorch nn.Linear layout); bias: (O,)."""
    B, L = latent.shape
    O, L_w = weight.shape
    assert L_w == L, "weight must be (output_size, latent_size)"

    x = latent.astype(jnp.float32)
    w = weight.astype(jnp.float32)
    b = bias.astype(jnp.float32)

    # ---- K tiling: single K block whenever the (128-padded) L fits in `tk`. ----
    l_pad128 = _round_up(L, 128)
    multi_k = l_pad128 > tk
    TK = tk if multi_k else l_pad128
    Lp = _round_up(L, TK)

    # ---- B tiling: one block if it fits (weight streams from HBM exactly once). ----
    if B <= tb:
        TB, Bp = B, B
    else:
        TB = tb
        Bp = _round_up(B, TB)

    # ---- O tiling: one block if it fits (no O/bias padding for small O). ----
    if O <= to:
        TO, Op = O, O
    else:
        TO = to
        Op = _round_up(O, TO)

    nb, no = Bp // TB, Op // TO

    # v7x megacore: don't let the parallel grid collapse to a single block when
    # there is enough batch to split (2 TensorCores per chip).
    if nb * no == 1 and B >= 256:
        TB = _round_up((B + 1) // 2, 8)
        Bp = _round_up(B, TB)
        nb = Bp // TB

    # ---- Zero-pad only where required (K always; B/O only when tiled). ----
    if (Bp, Lp) != (B, L):
        x = jnp.pad(x, ((0, Bp - B), (0, Lp - L)))
    if (Op, Lp) != (O, L):
        w = jnp.pad(w, ((0, Op - O), (0, Lp - L)))
    if Op != O:
        b = jnp.pad(b, (0, Op - O))
    b2 = b.reshape(1, Op)

    # VMEM budget: 2x double-buffered x/w/out tiles + bias + headroom, capped so
    # we never ask for more than v7x's 64 MiB physical VMEM per TensorCore.
    vmem_bytes = 4 * (2 * TB * TK + 2 * TO * TK + 2 * TB * TO + 2 * Op) + (2 << 20)
    vmem_limit = int(min(max(vmem_bytes, 32 << 20), 64 << 20))

    if multi_k:
        grid = (nb, no, Lp // TK)
        kernel = _mlp_repr_kernel_multi_k
        in_specs = [
            pl.BlockSpec((TB, TK), lambda i, j, k: (i, k)),   # x
            pl.BlockSpec((TO, TK), lambda i, j, k: (j, k)),   # weight (O, L) layout
            pl.BlockSpec((1, TO), lambda i, j, k: (0, j)),    # bias
        ]
        out_specs = pl.BlockSpec((TB, TO), lambda i, j, k: (i, j))
        dims = ("parallel", "parallel", "arbitrary")
    else:
        grid = (nb, no)
        kernel = _mlp_repr_kernel_single_k
        in_specs = [
            pl.BlockSpec((TB, TK), lambda i, j: (i, 0)),      # x (full K)
            pl.BlockSpec((TO, TK), lambda i, j: (j, 0)),      # weight (full K)
            pl.BlockSpec((1, TO), lambda i, j: (0, j)),       # bias
        ]
        out_specs = pl.BlockSpec((TB, TO), lambda i, j: (i, j))
        dims = ("parallel", "parallel")

    out = pl.pallas_call(
        kernel,
        out_shape=jax.ShapeDtypeStruct((Bp, Op), jnp.float32),
        grid_spec=pltpu.PrefetchScalarGridSpec(
            num_scalar_prefetch=0,
            grid=grid,
            in_specs=in_specs,
            out_specs=out_specs,
        ),
        compiler_params=pltpu.CompilerParams(
            dimension_semantics=dims,
            vmem_limit_bytes=vmem_limit,
        ),
    )(x, w, b2)

    if (Bp, Op) != (B, O):
        out = out[:B, :O]
    return out


# --------------------------------------------------------------------------- #
# Reference + tests
# --------------------------------------------------------------------------- #
def _reference(latent, weight, bias):
    z = lax.dot_general(latent, weight, (((1,), (1,)), ((), ())),
                        precision=lax.Precision.HIGHEST) + bias
    return jax.nn.sigmoid(z)


def _make_inputs(key, batch, latent_size, output_size):
    k_x, k_w, k_b = jax.random.split(key, 3)
    bound = 1.0 / jnp.sqrt(latent_size)
    latent = jax.random.normal(k_x, (batch, latent_size), dtype=jnp.float32)
    weight = jax.random.uniform(k_w, (output_size, latent_size),
                                minval=-bound, maxval=bound, dtype=jnp.float32)
    bias = jax.random.uniform(k_b, (output_size,),
                              minval=-bound, maxval=bound, dtype=jnp.float32)
    return latent, weight, bias


if __name__ == "__main__":
    key = jax.random.PRNGKey(0)
    k1, k2, k3 = jax.random.split(key, 3)

    # --- 1) Module-scale config (latent_size=32, output_size=16): tiny single-block path. ---
    latent, weight, bias = _make_inputs(k1, batch=8, latent_size=32, output_size=16)
    out = mlp_representation(latent, weight, bias)
    jax.block_until_ready(out)
    ref = _reference(latent, weight, bias)
    assert out.shape == (8, 16)
    assert jnp.allclose(out, ref, atol=1e-4, rtol=1e-4)

    # --- 2) Larger single-K case: exercises the split-B (megacore) parallel grid. ---
    latent2, weight2, bias2 = _make_inputs(k2, batch=512, latent_size=1024, output_size=512)
    out2 = mlp_representation(latent2, weight2, bias2)
    jax.block_until_ready(out2)
    ref2 = _reference(latent2, weight2, bias2)
    assert out2.shape == (512, 512)
    assert jnp.allclose(out2, ref2, atol=1e-3, rtol=1e-3)

    # --- 3) Multi-K case (L > 2048): exercises accumulate-into-o_ref with pl.when epilogue. ---
    latent3, weight3, bias3 = _make_inputs(k3, batch=256, latent_size=4096, output_size=384)
    out3 = mlp_representation(latent3, weight3, bias3)
    jax.block_until_ready(out3)
    ref3 = _reference(latent3, weight3, bias3)
    assert out3.shape == (256, 384)
    assert jnp.allclose(out3, ref3, atol=2e-3, rtol=2e-3)

    print("KERNEL_OK")
</pallas_src>

<mosaic_0001>
module attributes {stable_mosaic.version = 11 : i64} {
  func.func @_mlp_repr_kernel_single_k(%arg0: i32, %arg1: i32, %arg2: memref<8x128xf32, #tpu.memory_space<vmem>>, %arg3: memref<16x128xf32, #tpu.memory_space<vmem>>, %arg4: memref<1x16xf32, #tpu.memory_space<vmem>>, %arg5: memref<8x16xf32, #tpu.memory_space<vmem>>) attributes {dimension_semantics = [#tpu.dimension_semantics<parallel>, #tpu.dimension_semantics<parallel>], iteration_bounds = array<i64: 1, 1>, scalar_prefetch = 0 : i64, scratch_operands = 0 : i64, tpu.core_type = #tpu.core_type<tc>, window_params = [{transform_indices = @transform_0, window_bounds = array<i64: 8, 128>}, {transform_indices = @transform_1, window_bounds = array<i64: 16, 128>}, {transform_indices = @transform_2, window_bounds = array<i64: 1, 16>}, {transform_indices = @transform_3, window_bounds = array<i64: 8, 16>}]} {
    %c0 = arith.constant 0 : index
    %c0_0 = arith.constant 0 : index
    %0 = vector.load %arg2[%c0, %c0_0] : memref<8x128xf32, #tpu.memory_space<vmem>>, vector<8x128xf32>
    %c0_1 = arith.constant 0 : index
    %c0_2 = arith.constant 0 : index
    %1 = vector.load %arg3[%c0_1, %c0_2] : memref<16x128xf32, #tpu.memory_space<vmem>>, vector<16x128xf32>
    %cst = arith.constant dense<0.000000e+00> : vector<8x16xf32>
    %2 = tpu.matmul %0, %1, %cst {dimension_numbers = #tpu.dot_dimension_numbers<[1], [1], [0], [0], [0, 0, 1, 0], [], []>} : vector<8x128xf32>, vector<16x128xf32>, vector<8x16xf32> -> vector<8x16xf32>
    %c0_3 = arith.constant 0 : index
    %c0_4 = arith.constant 0 : index
    %3 = vector.load %arg4[%c0_3, %c0_4] : memref<1x16xf32, #tpu.memory_space<vmem>>, vector<1x16xf32>
    %4 = vector.broadcast %3 : vector<1x16xf32> to vector<8x16xf32>
    %5 = arith.addf %2, %4 : vector<8x16xf32>
    %cst_5 = arith.constant 5.000000e-01 : f32
    %6 = vector.broadcast %cst_5 : f32 to vector<8x16xf32>
    %7 = arith.mulf %6, %5 : vector<8x16xf32>
    %8 = math.tanh %7 : vector<8x16xf32>
    %cst_6 = arith.constant 5.000000e-01 : f32
    %9 = vector.broadcast %cst_6 : f32 to vector<8x16xf32>
    %10 = arith.mulf %9, %8 : vector<8x16xf32>
    %cst_7 = arith.constant 5.000000e-01 : f32
    %11 = vector.broadcast %cst_7 : f32 to vector<8x16xf32>
    %12 = arith.addf %10, %11 : vector<8x16xf32>
    %c0_8 = arith.constant 0 : index
    %c0_9 = arith.constant 0 : index
    %13 = vector.load %arg5[%c0_8, %c0_9] : memref<8x16xf32, #tpu.memory_space<vmem>>, vector<8x16xf32>
    tpu.vector_store %arg5[%c0_8, %c0_9], %12 {strides = array<i32>} : memref<8x16xf32, #tpu.memory_space<vmem>>, vector<8x16xf32>,
    return
  }
  func.func @transform_0(%arg0: i32, %arg1: i32) -> (i32, i32) {
    %c0_i32 = arith.constant 0 : i32
    %c0_i32_0 = arith.constant 0 : i32
    return %arg0, %c0_i32 : i32, i32
  }
  func.func @transform_1(%arg0: i32, %arg1: i32) -> (i32, i32) {
    %c0_i32 = arith.constant 0 : i32
    %c0_i32_0 = arith.constant 0 : i32
    return %arg1, %c0_i32 : i32, i32
  }
  func.func @transform_2(%arg0: i32, %arg1: i32) -> (i32, i32) {
    %c0_i32 = arith.constant 0 : i32
    %c0_i32_0 = arith.constant 0 : i32
    return %c0_i32, %arg1 : i32, i32
  }
  func.func @transform_3(%arg0: i32, %arg1: i32) -> (i32, i32) {
    %c0_i32 = arith.constant 0 : i32
    return %arg0, %arg1 : i32, i32
  }
}

</mosaic_0001>

<bundles_post_ra>
// kernel: tpu_custom_call.1
= control target key start
LH: loop header
LB: loop body
LE: loop exit
PB: predicated region body
PF: predicated region fallthrough
CT: control target
= control target key end

     0   :  { %8 = vsyncpa [#allocation3], 0  ;;  %s268_s0 = inlined_call_operand.hbm [shape: f32[8,128], index: 0, kind: input, shape index: {}]   ;;  %s269_s1 = inlined_call_operand.hbm [shape: f32[16,128], index: 1, kind: input, shape index: {}]   ;;  %s270_s2 = inlined_call_operand.vmem [shape: f32[1,16], index: 2, kind: input, shape index: {}]   ;;  %s271_s3 = inlined_call_operand.hbm [shape: f32[8,16], index: 3, kind: output, shape index: {}]  }
   0x1   :  { %9 = vsyncpa [#allocation6], 0 }
   0x2   :  { %10 = vsyncpa [#allocation4], 0  ;;  %s229_s12 = smov [#allocation2]   ;;  %s230_s14 = smov [#allocation5]  }
   0x3   :  { %s17_s13 = sshll.u32 %s229_s12, 4  ;;  %s26_s15 = sshll.u32 %s230_s14, 4  ;;  %s18_s13 = int_to_ptr.vmem [resolvable:$true] %s17_s13  ;;  %s27_s15 = int_to_ptr.vmem [resolvable:$true] %s26_s15 }
   0x4   :  { %s171_s16 = scalar_lea.vmem %s18_s13, 128  ;;  %p176_p1 = scmp.lt.s32.totalorder %s18_s13, %s18_s13 }
   0x5   :  { %p172_p0 = scmp.ne.s32.totalorder %s18_s13, %s171_s16  ;;  %p177_p2 = scmp.lt.s32.totalorder %s171_s16, %s171_s16 }
   0x7   :  { %p178_p3 = por %p177_p2, %p176_p1 }
   0x9   :  { %p179_p4 = pnand %p178_p3, %p172_p0 }
   0xb   :  { %182 = shalt.err (!%p179_p4)
}
   0xc   :  { %20 = dma.hbm_to_vmem [thread:$0]  %s268_s0, 128, %s18_s13, [#allocation3]  }
   0xd   :  { %s191_s19 = scalar_lea.vmem %s27_s15, 256  ;;  %p196_p6 = scmp.lt.s32.totalorder %s27_s15, %s27_s15 }
   0xe   :  { %p192_p5 = scmp.ne.s32.totalorder %s27_s15, %s191_s19  ;;  %p197_p7 = scmp.lt.s32.totalorder %s191_s19, %s191_s19 }
  0x10   :  { %p198_p8 = por %p197_p7, %p196_p6 }
  0x12   :  { %p199_p9 = pnand %p198_p8, %p192_p5 }
  0x14   :  { %202 = shalt.err (!%p199_p9)
}
  0x15   :  { %s231_s20 = smov 128   ;;  %s232_s21 = smov 8  }
  0x16   :  { %32 = dma.hbm_to_vmem [thread:$0]  %s269_s1, 256, %s27_s15, [#allocation6], %s231_s20, %s231_s20, %s232_s21  }
  0x17   :  { %223 = dma.done.wait [#allocation3], 128  }
  0x18   :  { %224 = vsyncadd [#allocation3], 4294967168 }
  0x19   :  { %225 = dma.done.wait [#allocation6], 256  }
  0x1a   :  { %226 = vsyncadd [#allocation6], 4294967040  ;;  %v233_v0 = vmov 0.0   ;;  %vm234_vm0 = vmmov 0   ;;  %v43_v1 = vld [vmem:[#allocation5 + $0x8] sm:$0xff]  ;;  %v42_v2 = vld [vmem:[#allocation5] sm:$0xff] }
  0x1b   :  { %147 = vmatprep.subr.mxu0 %v233_v0  ;;  %151 = vmatprep.mubr.msk.f32.mxu0 %vm234_vm0, %v233_v0  ;;  %v41_v3 = vld [vmem:[#allocation2] sm:$0xff]  ;;  %s235_s1 = smov [#allocation7]   ;;  %vm125_vm1 = vcmask 130048  }
  0x1c   :  { %148 = vmatpush3.xpose.msra.mxu0 %v43_v1  ;;  %v143_v4 = vld [vmem:[%s270_s2] ss:$0 sm:$0xff]  ;;  %s133_s25 = sshll.u32 %s235_s1, 4  ;;  %s134_s25 = int_to_ptr.vmem [resolvable:$true] %s133_s25 }
  0x1d   :  { %149 = vmatprep.subr.mxu0 %v233_v0  ;;  %s203_s26 = scalar_lea.vmem %s134_s25, 128  ;;  %p208_p11 = scmp.lt.s32.totalorder %s134_s25, %s134_s25 }
  0x1e   :  { %p204_p10 = scmp.ne.s32.totalorder %s134_s25, %s203_s26  ;;  %p209_p12 = scmp.lt.s32.totalorder %s203_s26, %s203_s26 }
  0x20   :  { %150 = vmatpush3.xpose.msra.mxu0 %v42_v2  ;;  %p210_p13 = por %p209_p12, %p208_p11 }
  0x22   :  { %p211_p0 = pnand %p210_p13, %p204_p10 }
  0x23   :  { %152 = vmatmul.mubr.f32.vlgmr.msra.gmra.mxu0 %v41_v3 }
  0xe3   :  { %v117_v5 = vpop.f32.mrf.mxu0 }
  0xe4   :  { %v118_v6 = vadd.f32 %v143_v4, %v117_v5 }
  0xe5   :  { %v153_v7 = vpop.f32.mrf.mxu0 }
  0xe6   :  { %v121_v8 = vmul.f32 0.5, %v118_v6 }
  0xe8   :  { %161 = vtanh.f32 %v121_v8 }
  0xf5   :  { %v162_v9 = vpop.eup %161 }
  0xf6   :  { %v123_v10 = vmul.f32 0.5, %v162_v9 }
  0xf8   :  { %v124_v11 = vadd.f32 0.5, %v123_v10 }
  0xfa   :  { %126 = vst.msk [vmem:[#allocation7] sm:$0xff] %vm125_vm1, %v124_v11 }
  0xfb   :  { %214 = shalt.err (!%p211_p0)
}
  0xfc   :  { %136 = dma.vmem_to_hbm [thread:$0]  %s134_s25, 128, %s271_s3, [#allocation4]  }
  0xfd   :  { %227 = dma.done.wait [#allocation4], 128  }
  0xfe   :  { %228 = vsyncadd [#allocation4], 4294967168 }
  0xff   :  { %140 = vsyncpa [#allocation3], 1 }
 0x100   :  { %141 = vsyncpa [#allocation6], 1 }
 0x101   :  { %142 = vsyncpa [#allocation4], 1 }

</bundles_post_ra>
